<compile_context>
chip_gen: v6e
topology: v6e:2x2x1
jax: 0.10.0
libtpu: 0.0.40
codegen_flags: <defaults>
</compile_context>

<pallas_src>
import functools

import jax
import jax.numpy as jnp
from jax.experimental import pallas as pl
from jax.experimental.pallas import tpu as pltpu


# ----------------------------------------------------------------------------
# tiling helpers
# ----------------------------------------------------------------------------
def _round_down_mult(x, m):
    return max(m, (x // m) * m)


def _sublane_mult(dtype):
    """Row-tile alignment: sub-32-bit dtypes pack along sublanes."""
    itemsize = jnp.dtype(dtype).itemsize
    if itemsize >= 4:
        return 8
    if itemsize == 2:
        return 16
    return 32


def _vmem_budget_bytes(frac=0.75):
    """Generation-aware VMEM budget (v5e/v6e: 128 MiB, v7x: 64 MiB per TC),
    with ~25% headroom left for Mosaic internal scratch."""
    cap = 64 << 20  # conservative fallback (v7x per-TensorCore capacity)
    try:
        cap = int(pltpu.get_tpu_info().vmem_capacity_bytes)
    except Exception:
        pass
    return int(cap * frac)


def _pick_rows_block(rows, tile_width, dtype, requested, tile_bytes_budget,
                     min_blocks=2):
    """Largest row tile <= requested such that one (rows, tile_width) tile
    stays within tile_bytes_budget, dtype-aware sublane alignment, and (when
    rows allow) at least `min_blocks` row tiles so both v7x TCs get work."""
    itemsize = jnp.dtype(dtype).itemsize
    sub = _sublane_mult(dtype)
    br = min(requested, rows)
    max_fit = max(sub, tile_bytes_budget // max(1, tile_width * itemsize))
    br = min(br, max_fit)
    if br >= rows:
        br = rows                      # full extent is always a legal block dim
        if min_blocks > 1 and rows >= min_blocks * sub:
            br = _round_down_mult(pl.cdiv(rows, min_blocks), sub)
    else:
        br = _round_down_mult(br, sub)  # partial last block is masked by Pallas
    return br


def _pick_k_block(d, max_tk):
    """K tile must divide d exactly (a padded partial block on the reduction
    axis would feed undefined values into the accumulation).  Prefer
    256-aligned tiles (v6e/v7x MXU), then 128-aligned."""
    if d <= max_tk:
        return d
    for align in (256, 128):
        tk = (min(max_tk, d) // align) * align
        while tk >= align:
            if d % tk == 0:
                return tk
            tk -= align
    return d  # fall back to un-tiled K


# ----------------------------------------------------------------------------
# Kernel 1: generic residual add (out = x + y), y = sublayer(x) precomputed.
# Add in f32, single cast at the end (matches adding before any downcast).
# ----------------------------------------------------------------------------
def _residual_add_kernel(x_ref, y_ref, o_ref):
    o_ref[...] = (x_ref[...].astype(jnp.float32)
                  + y_ref[...].astype(jnp.float32)).astype(o_ref.dtype)


def skip_connection(x, sublayer_fn, *, block_rows=1024, donate_x=False):
    """Exact SkipConnection semantics: x + sublayer_fn(x) for ANY sublayer.

    NOTE: a standalone residual-add kernel is inherently ~1.5x the minimum HBM
    traffic (y is materialized and re-read).  In a real model fuse the add into
    the sublayer epilogue -- see skip_connection_fused_linear.
    Set donate_x=True only if the caller never uses x after this call;
    otherwise XLA inserts a protective copy that negates the aliasing saving.
    """
    y = sublayer_fn(x)                 # arbitrary sublayer runs in plain JAX
    B, S, D = x.shape
    rows = B * S
    out_dt = jnp.result_type(x.dtype, y.dtype)
    x2 = x.reshape(rows, D)
    y2 = y.reshape(rows, D)
    itemsize = jnp.dtype(out_dt).itemsize
    budget = _vmem_budget_bytes()

    narrow_dt = (x.dtype if jnp.dtype(x.dtype).itemsize
                 <= jnp.dtype(y.dtype).itemsize else y.dtype)
    br = _pick_rows_block(rows, D, narrow_dt, block_rows, budget // 8)
    grid = (pl.cdiv(rows, br),)

    vmem_est = 3 * 2 * br * D * itemsize       # x, y, out double-buffered
    vmem_limit = int(min(max(2 * vmem_est, 16 << 20), budget))

    out2 = pl.pallas_call(
        _residual_add_kernel,
        out_shape=jax.ShapeDtypeStruct((rows, D), out_dt),
        grid_spec=pltpu.PrefetchScalarGridSpec(
            num_scalar_prefetch=0,
            grid=grid,
            in_specs=[
                pl.BlockSpec((br, D), lambda i: (i, 0)),
                pl.BlockSpec((br, D), lambda i: (i, 0)),
            ],
            out_specs=pl.BlockSpec((br, D), lambda i: (i, 0)),
        ),
        input_output_aliases=({0: 0} if (donate_x and out_dt == x.dtype)
                              else {}),
        compiler_params=pltpu.CompilerParams(
            dimension_semantics=("parallel",),
            vmem_limit_bytes=vmem_limit),
        cost_estimate=pl.CostEstimate(
            flops=rows * D,
            transcendentals=0,
            bytes_accessed=3 * rows * D * itemsize),
    )(x2, y2)
    return out2.reshape(B, S, D)


# ----------------------------------------------------------------------------
# Kernel 2: fused skip + Linear sublayer (out = x + x @ W + b), all in-kernel.
# ----------------------------------------------------------------------------
def _skip_linear_fullk_kernel(x_lhs_ref, w_ref, b_ref, x_res_ref, o_ref, *,
                              mxu_dtype):
    # Full-K single dot: no accumulator scratch, no k-phase branches.
    lhs = x_lhs_ref[...]
    rhs = w_ref[...]
    if mxu_dtype is not None:                  # static: optional bf16 MXU feed
        lhs = lhs.astype(mxu_dtype)
        rhs = rhs.astype(mxu_dtype)
    acc = jnp.dot(lhs, rhs, preferred_element_type=jnp.float32)
    acc = acc + x_res_ref[...].astype(jnp.float32) \
              + b_ref[...].astype(jnp.float32)
    o_ref[...] = acc.astype(o_ref.dtype)


def _skip_linear_ktiled_kernel(x_lhs_ref, w_ref, b_ref, x_res_ref, o_ref,
                               acc_ref, *, mxu_dtype):
    k = pl.program_id(2)

    @pl.when(k == 0)
    def _():
        # Seed accumulator with residual + bias (saves a separate final add).
        acc_ref[...] = (x_res_ref[...].astype(jnp.float32)
                        + b_ref[...].astype(jnp.float32))

    lhs = x_lhs_ref[...]
    rhs = w_ref[...]
    if mxu_dtype is not None:
        lhs = lhs.astype(mxu_dtype)
        rhs = rhs.astype(mxu_dtype)
    acc_ref[...] += jnp.dot(lhs, rhs, preferred_element_type=jnp.float32)

    @pl.when(k == pl.num_programs(2) - 1)
    def _():
        o_ref[...] = acc_ref[...].astype(o_ref.dtype)


def skip_connection_fused_linear(x, w, b, *, block_rows=None, block_n=None,
                                 block_k=None, mxu_dtype=None):
    """out = x + (x @ w + b), fused residual + Linear sublayer on-TPU.

    mxu_dtype: optionally cast the MXU operands in-kernel (e.g. jnp.bfloat16)
    when exact f32 matmul is not required; f32 accumulation is kept either way.
    Ideally pass bf16 x/w end-to-end instead (halves HBM traffic too).
    """
    B, S, D = x.shape
    assert w.shape == (D, D) and b.shape == (D,)
    rows = B * S
    x2 = x.reshape(rows, D)
    b2 = b.reshape(1, D)
    dt = x.dtype
    itemsize = jnp.dtype(dt).itemsize
    sub = _sublane_mult(dt)
    budget = _vmem_budget_bytes()

    # Large defaults: the GEMM only becomes compute-bound on v6e/v7x with
    # >=512-wide tiles (ridge ~650 flop/byte); VMEM-fit loop below guards v7x.
    if block_rows is None:
        block_rows = 512 if itemsize >= 4 else 1024
    if block_n is None:
        block_n = 512 if itemsize >= 4 else 1024

    # N tile: lane-dense, 256-aligned when tiled (v6e/v7x MXU = 2x256x256).
    tn = min(block_n, D)
    if tn < D:
        align = 256 if tn >= 256 else 128
        tn = _round_down_mult(tn, align)

    def pick_tm(width):
        # Budget tm against the actual (tm, width) tiles it creates.
        return _pick_rows_block(rows, width, dt, block_rows, budget // 6)

    force_ktiled = block_k is not None and block_k < D

    # ------------------------------------------------------------------ path A
    if not force_ktiled:
        def fullk_bytes(tm_, tn_):
            # double-buffered: (tm,D) x slab, (D,tn) W panel, bias, res, out
            return 2 * (tm_ * D + D * tn_ + tn_ + 2 * tm_ * tn_) * itemsize

        tm = pick_tm(D)
        while fullk_bytes(tm, tn) > budget:
            if tn > 256 and tn >= tm:
                tn = _round_down_mult(tn // 2, 128)
            elif tm > sub:
                tm = _round_down_mult(tm // 2, sub)
            elif tn > 128:
                tn = _round_down_mult(tn // 2, 128)
            else:
                break

        if fullk_bytes(tm, tn) <= budget:
            # N axis OUTER so the (D, tn) W panel's block index is constant
            # across the row sweep -> DMAed once per output-column tile.
            grid = (pl.cdiv(D, tn), pl.cdiv(rows, tm))
            vmem_limit = int(min(max(int(1.5 * fullk_bytes(tm, tn)), 16 << 20),
                                 budget))
            out2 = pl.pallas_call(
                functools.partial(_skip_linear_fullk_kernel,
                                  mxu_dtype=mxu_dtype),
                out_shape=jax.ShapeDtypeStruct((rows, D), dt),
                grid_spec=pltpu.PrefetchScalarGridSpec(
                    num_scalar_prefetch=0,
                    grid=grid,
                    in_specs=[
                        pl.BlockSpec((tm, D), lambda j, i: (i, 0)),   # x (LHS)
                        pl.BlockSpec((D, tn), lambda j, i: (0, j)),   # W panel
                        pl.BlockSpec((1, tn), lambda j, i: (0, j)),   # bias
                        pl.BlockSpec((tm, tn), lambda j, i: (i, j)),  # residual
                    ],
                    out_specs=pl.BlockSpec((tm, tn), lambda j, i: (i, j)),
                ),
                compiler_params=pltpu.CompilerParams(
                    dimension_semantics=("parallel", "parallel"),
                    vmem_limit_bytes=vmem_limit),
                cost_estimate=pl.CostEstimate(
                    flops=2 * rows * D * D,
                    transcendentals=0,
                    bytes_accessed=(rows * D * pl.cdiv(D, tn) + D * D + D
                                    + 2 * rows * D) * itemsize),
            )(x2, w, b2, x2)
            return out2.reshape(B, S, D)
        force_ktiled = True  # could not fit a full-K working set

    # ------------------------------------------------------------------ path B
    # K-tiled with a resident f32 accumulator; K innermost ("arbitrary").
    # NOTE: do NOT alias x->out here: output column blocks overlap x columns
    # that later j iterations still read as MXU LHS.
    tk = _pick_k_block(D, block_k if block_k is not None else 512)
    tm = pick_tm(max(tk, tn))
    grid = (pl.cdiv(rows, tm), pl.cdiv(D, tn), D // tk)

    ktiled_bytes = (2 * (tm * tk + tk * tn + tn + 2 * tm * tn) * itemsize
                    + tm * tn * 4)
    vmem_limit = int(min(max(int(1.5 * ktiled_bytes), 16 << 20), budget))

    # TODO(synk): a partial last row tile feeds padded rows into the MXU; the
    # masked output store keeps results correct, but NaN-checking tooling may
    # flag the discarded lanes.
    out2 = pl.pallas_call(
        functools.partial(_skip_linear_ktiled_kernel, mxu_dtype=mxu_dtype),
        out_shape=jax.ShapeDtypeStruct((rows, D), dt),
        grid_spec=pltpu.PrefetchScalarGridSpec(
            num_scalar_prefetch=0,
            grid=grid,
            in_specs=[
                pl.BlockSpec((tm, tk), lambda i, j, k: (i, k)),   # x (MXU LHS)
                pl.BlockSpec((tk, tn), lambda i, j, k: (k, j)),   # W tile
                pl.BlockSpec((1, tn), lambda i, j, k: (0, j)),    # bias tile
                pl.BlockSpec((tm, tn), lambda i, j, k: (i, j)),   # x (residual)
            ],
            out_specs=pl.BlockSpec((tm, tn), lambda i, j, k: (i, j)),
            scratch_shapes=[pltpu.VMEM((tm, tn), jnp.float32)],
        ),
        compiler_params=pltpu.CompilerParams(
            dimension_semantics=("parallel", "parallel", "arbitrary"),
            vmem_limit_bytes=vmem_limit),
        cost_estimate=pl.CostEstimate(
            flops=2 * rows * D * D,
            transcendentals=0,
            bytes_accessed=(2 * rows * D + D * D + D + rows * D) * itemsize),
    )(x2, w, b2, x2)
    return out2.reshape(B, S, D)


if __name__ == "__main__":
    key = jax.random.PRNGKey(0)
    kx, kw, kb, kx2, kw2, kb2 = jax.random.split(key, 6)

    # ---- test 1: small GPT-2-ish shape (f32) -> full-K single-pass path.
    batch, seq_len, d_model = 2, 8, 128
    x = jax.random.normal(kx, (batch, seq_len, d_model), dtype=jnp.float32)
    w = jax.random.normal(kw, (d_model, d_model), dtype=jnp.float32) * 0.02
    b = jax.random.normal(kb, (d_model,), dtype=jnp.float32) * 0.02

    def sublayer_fn(t):
        return jnp.einsum("bsd,de->bse", t, w,
                          precision=jax.lax.Precision.HIGHEST) + b

    generic = jax.jit(lambda t: skip_connection(t, sublayer_fn))
    fused = jax.jit(skip_connection_fused_linear)

    out_generic = jax.block_until_ready(generic(x))
    out_fused = jax.block_until_ready(fused(x, w, b))

    ref = x + sublayer_fn(x)
    assert jnp.allclose(out_generic, ref, atol=1e-5, rtol=1e-5)
    assert jnp.allclose(out_fused, ref, atol=1e-4, rtol=1e-4)

    # ---- test 2: explicit block_k -> K-tiled path with multi-step (M,N,K)
    #      grid and the resident f32 accumulator.
    batch2, seq2, d2 = 2, 256, 256
    x_b = jax.random.normal(kx2, (batch2, seq2, d2), dtype=jnp.float32)
    w_b = jax.random.normal(kw2, (d2, d2), dtype=jnp.float32) * 0.02
    b_b = jax.random.normal(kb2, (d2,), dtype=jnp.float32) * 0.02

    fused_ktiled = jax.jit(functools.partial(
        skip_connection_fused_linear, block_rows=128, block_n=128,
        block_k=128))
    out_b = jax.block_until_ready(fused_ktiled(x_b, w_b, b_b))
    ref_b = x_b + (jnp.einsum("bsd,de->bse", x_b, w_b,
                              precision=jax.lax.Precision.HIGHEST) + b_b)
    assert jnp.allclose(out_b, ref_b, atol=1e-4, rtol=1e-4)

    # ---- test 3: bf16 end-to-end (MXU-native dtype, f32 accumulation).
    x_h = x_b.astype(jnp.bfloat16)
    w_h = w_b.astype(jnp.bfloat16)
    b_h = b_b.astype(jnp.bfloat16)
    out_h = jax.block_until_ready(fused(x_h, w_h, b_h))
    ref_h = (x_h.astype(jnp.float32)
             + jnp.einsum("bsd,de->bse", x_h.astype(jnp.float32),
                          w_h.astype(jnp.float32),
                          precision=jax.lax.Precision.HIGHEST)
             + b_h.astype(jnp.float32))
    assert jnp.allclose(out_h.astype(jnp.float32), ref_h, atol=5e-2, rtol=5e-2)

    print("KERNEL_OK")
</pallas_src>

<mosaic_0001>
module attributes {stable_mosaic.version = 11 : i64} {
  func.func @_residual_add_kernel(%arg0: i32, %arg1: memref<8x128xf32, #tpu.memory_space<vmem>>, %arg2: memref<8x128xf32, #tpu.memory_space<vmem>>, %arg3: memref<8x128xf32, #tpu.memory_space<vmem>>) attributes {dimension_semantics = [#tpu.dimension_semantics<parallel>], iteration_bounds = array<i64: 2>, scalar_prefetch = 0 : i64, scratch_operands = 0 : i64, tpu.core_type = #tpu.core_type<tc>, window_params = [{transform_indices = @transform_0, window_bounds = array<i64: 8, 128>}, {transform_indices = @transform_1, window_bounds = array<i64: 8, 128>}, {transform_indices = @transform_2, window_bounds = array<i64: 8, 128>}]} {
    %c0 = arith.constant 0 : index
    %c0_0 = arith.constant 0 : index
    %0 = vector.load %arg1[%c0, %c0_0] : memref<8x128xf32, #tpu.memory_space<vmem>>, vector<8x128xf32>
    %c0_1 = arith.constant 0 : index
    %c0_2 = arith.constant 0 : index
    %1 = vector.load %arg2[%c0_1, %c0_2] : memref<8x128xf32, #tpu.memory_space<vmem>>, vector<8x128xf32>
    %2 = arith.addf %0, %1 : vector<8x128xf32>
    %c0_3 = arith.constant 0 : index
    %c0_4 = arith.constant 0 : index
    %3 = vector.load %arg3[%c0_3, %c0_4] : memref<8x128xf32, #tpu.memory_space<vmem>>, vector<8x128xf32>
    tpu.vector_store %arg3[%c0_3, %c0_4], %2 {strides = array<i32>} : memref<8x128xf32, #tpu.memory_space<vmem>>, vector<8x128xf32>,
    return
  }
  func.func @transform_0(%arg0: i32) -> (i32, i32) {
    %c0_i32 = arith.constant 0 : i32
    %c0_i32_0 = arith.constant 0 : i32
    return %arg0, %c0_i32 : i32, i32
  }
  func.func @transform_1(%arg0: i32) -> (i32, i32) {
    %c0_i32 = arith.constant 0 : i32
    %c0_i32_0 = arith.constant 0 : i32
    return %arg0, %c0_i32 : i32, i32
  }
  func.func @transform_2(%arg0: i32) -> (i32, i32) {
    %c0_i32 = arith.constant 0 : i32
    %c0_i32_0 = arith.constant 0 : i32
    return %arg0, %c0_i32 : i32, i32
  }
}

</mosaic_0001>

<bundles_post_ra>
// kernel: _lambda_.1
= control target key start
LH: loop header
LB: loop body
LE: loop exit
PB: predicated region body
PF: predicated region fallthrough
CT: control target
= control target key end

     0   :  { %7 = vsyncpa [#allocation3], 0  ;;  %s463_s0 = inlined_call_operand.vmem [shape: f32[16,128], index: 0, kind: input, shape index: {}]   ;;  %s464_s1 = inlined_call_operand.vmem [shape: f32[16,128], index: 1, kind: input, shape index: {}]   ;;  %s465_s2 = inlined_call_operand.hbm [shape: f32[16,128], index: 2, kind: output, shape index: {}]  }
   0x1   :  { %9 = vsyncpa [#allocation3 + $0x1], 0  ;;  %s373_s9 = smov 0   ;;  %s375_s10 = smov 0  }
   0x2   :  { %s377_s11 = smov 0   ;;  %s379_s12 = smov 0  }
   0x3 LB: > { %s394_s13 = sadd.s32 4294967295, %s355_s12   ;;  %s245_s14 = sadd.s32 4294967294, %s355_s12   ;;  %s355_s12 = sphi %s379_s12, %s471_s12   ;;  %s351_s11 = sphi %s377_s11, %s470_s11   ;;  %s347_s10 = sphi %s375_s10, %s469_s10   ;;  %s343_s9 = sphi %s373_s9, %s468_s9  }
   0x4   : > { %s398_s15 = sadd.s32 1, %s355_s12   ;;  %s74_s16 = sadd.s32 1, %s351_s11 }
   0x5   : > { %s71_s17 = ssub.s32 %s355_s12, %s398_s15  ;;  %p84_p0 = scmp.ne.s32.totalorder %s351_s11, %s347_s10 }
   0x6   : > { %p72_p1 = scmp.eq.s32.totalorder %s71_s17, 0  ;;  %p85_p2 = scmp.eq.s32.totalorder %s394_s13, 1 }
   0x7   : > { %p90_p3 = scmp.ne.s32.totalorder %s347_s10, %s343_s9  ;;  %p91_p4 = scmp.eq.s32.totalorder %s245_s14, 1 }
   0x8   : > { %s409_s18 = scalar_select %p72_p1, %s351_s11, %s74_s16  }
   0x9   : > { %p411_p5 = por %p85_p2, %p84_p0  ;;  %p415_p6 = por %p91_p4, %p90_p3 }
   0xa   : > { %p248_p7 = scmp.ge.s32.totalorder %s355_s12, 1  ;;  %p123_p8 = scmp.lt.s32.totalorder %s355_s12, 3 }
   0xc   : > { %p124_p9 = pnand %p248_p7, %p123_p8 }
   0xd   : > { %s145_s21 = sand.u32 (!%p124_p9), 1, %s347_s10   ;;  %p148_p10 = scmp.lt.s32.totalorder (!%p124_p9), %s394_s13, 1 }
   0xe   : > { %127 = sbr.rel (%p124_p9) target bundleno = 42 (0x2a), region = 28  ;;  %s249_s22 = sshll.u32 (!%p124_p9), %s145_s21, 3 }
   0xf   : > { %s253_s24 = sshll.u32 (!%p124_p9), %s394_s13, 7  ;;  %s147_s26 = scalar_lea.vmem (!%p124_p9), [#allocation2], %s249_s22 }
  0x10   : > { %s174_s27 = sshll.u32 (!%p124_p9), %s147_s26, 4  ;;  %s172_s8 = scalar_lea.hbm (!%p124_p9), %s465_s2, %s253_s24  ;;  %s175_s27 = int_to_ptr.vmem [resolvable:$true] %s174_s27 }
  0x11   : > { %s295_s14 = scalar_lea.vmem (!%p124_p9), %s175_s27, 128  ;;  %s357_s16 = smov (!%p124_p9), [#allocation2]  }
  0x12   : > { %p296_p11 = scmp.ne.s32.totalorder (!%p124_p9), %s175_s27, %s295_s14  ;;  %s299_s17 = sshll.u32 (!%p124_p9), %s357_s16, 4  ;;  %s300_s17 = int_to_ptr.vmem [resolvable:$false] %s299_s17 }
  0x13   : > { %s149_s23 = scalar_select %p148_p10, %s394_s13, 1 }
  0x14   : > { %s161_s13 = scalar_lea.sflag [#allocation3], %s145_s21  ;;  %p297_p12 = pnand %p296_p11, %p411_p5 }
  0x15   : > { %s250_s25 = sshll.u32 %s149_s23, 3  ;;  %s301_s22 = scalar_lea.vmem %s300_s17, 256 }
  0x16   : > { %s151_s30 = scalar_lea.vmem %s463_s0, %s250_s25  ;;  %s155_s5 = scalar_lea.vmem %s464_s1, %s250_s25 }
  0x17   : > { %v156_v0 = vld [vmem:[%s151_s30] sm:$0xff]  ;;  %p298_p13 = pneg %p297_p12  ;;  %p302_p0 = scmp.lt.s32.totalorder %s175_s27, %s300_s17 }
  0x18   : > { %v157_v1 = vld [vmem:[%s155_s5] sm:$0xff]  ;;  %p303_p1 = scmp.lt.s32.totalorder %s301_s22, %s295_s14 }
  0x19   : > { %v158_v2 = vadd.f32 %v157_v1, %v156_v0 }
  0x1a   : > { %p304_p2 = por %p303_p1, %p302_p0 }
  0x1b   : > { %159 = vst [vmem:[%s147_s26] sm:$0xff] %v158_v2 }
  0x1c   : > { %p305_p3 = pnand %p304_p2, %p298_p13 }
  0x1e   : > { %308 = shalt.err (!%p305_p3)
}
  0x1f   : > { %s309_s23 = scalar_lea.hbm %s172_s8, 128  ;;  %s313_s25 = scalar_lea.hbm %s465_s2, 256 }
  0x20   : > { %p310_p4 = scmp.ne.s32.totalorder %s172_s8, %s309_s23  ;;  %p314_p9 = scmp.lt.s32.totalorder %s172_s8, %s465_s2 }
  0x21   : > { %p315_p10 = scmp.lt.s32.totalorder %s313_s25, %s309_s23 }
  0x22   : > { %p311_p7 = pnand %p310_p4, %p411_p5 }
  0x23   : > { %p316_p11 = por %p315_p10, %p314_p9 }
  0x24   : > { %p312_p8 = pneg %p311_p7 }
  0x26   : > { %p317_p12 = pnand %p316_p11, %p312_p8 }
  0x28   : > { %320 = shalt.err (!%p317_p12)
}
  0x29   : > { %256 = dma.vmem_to_hbm [thread:$0]  (%p411_p5), %s175_s27, 128, %s172_s8, %s161_s13  }
  0x2a PF: > { %p262_p13 = scmp.ge.s32.totalorder %s355_s12, 2  ;;  %s186_s29 = sand.u32 1, %s343_s9  }
  0x2b   : > { %s187_s30 = scalar_lea.sflag [#allocation3], %s186_s29 }
  0x2c   : > { %p259_p0 = pnand %p262_p13, %p415_p6 }
  0x2e   : > { %p260_p1 = pneg %p259_p0 }
  0x30   : > { %338 = dma.done.wait (%p260_p1), %s187_s30, 128  }
  0x31   : > { %340 = vsyncadd (%p260_p1), %s187_s30, 4294967168  ;;  %p12_p2 = scmp.ge.s32.totalorder %s398_s15, 4   ;;  %s468_s9 = smov %s347_s10 }
  0x32   : > { %s469_s10 = smov %s351_s11  ;;  %s470_s11 = smov %s409_s18 }
  0x33   : > { %s471_s12 = smov %s398_s15  ;;  %14 = sbr.rel (!%p12_p2) target bundleno = 3 (0x3), region = 66 }
  0x38   :  { %192 = vsyncpa [#allocation3], 1 }
  0x39   :  { %194 = vsyncpa [#allocation3 + $0x1], 1 }

</bundles_post_ra>
